<compile_context>
chip_gen: v7x
topology: tpu7x:2x2x1
jax: 0.10.0
libtpu: 0.0.40
codegen_flags: <defaults>
</compile_context>

<pallas_src>
import functools

import jax
import jax.numpy as jnp
from jax.experimental import pallas as pl
from jax.experimental.pallas import tpu as pltpu


def _round_up(x, m):
    return (x + m - 1) // m * m


def _pad2d(x, rows, cols):
    return jnp.pad(x, ((0, rows - x.shape[0]), (0, cols - x.shape[1])))


def _vmem_limit_bytes():
    """Per-generation VMEM budget.

    v7x has 64 MiB/TC -> stay at <=48 MiB; v5e/v6e have 128 MiB -> use up to
    ~112 MiB. Falls back to the v7x-safe 48 MiB if the query is unavailable.
    """
    try:
        cap = getattr(pltpu.get_tpu_info(), "vmem_capacity_bytes", None)
    except Exception:
        cap = None
    if not cap:
        return 48 * 1024 * 1024
    return min(int(cap) * 3 // 4, 112 * 1024 * 1024)


# --------------------------------------------------------------------------
# Small-graph path: one fused single-block kernel per layer.
#   Y = A_hat @ bf16(X @ W) + b  (+ optional ReLU), everything resident.
# --------------------------------------------------------------------------
def _layer_single_block_kernel(a_ref, h_ref, w_ref, b_ref, o_ref, *, apply_relu):
    t = jnp.dot(h_ref[...], w_ref[...], preferred_element_type=jnp.float32)
    y = jnp.dot(a_ref[...], t.astype(jnp.bfloat16),
                preferred_element_type=jnp.float32) + b_ref[...]
    if apply_relu:
        y = jnp.maximum(y, 0.0)
    o_ref[...] = y.astype(o_ref.dtype)


def _layer_single_block(a, h, w, b2d, *, apply_relu, out_dtype, vmem_limit):
    n_pad = a.shape[0]
    c_in = w.shape[0]
    c_out = w.shape[1]
    return pl.pallas_call(
        functools.partial(_layer_single_block_kernel, apply_relu=apply_relu),
        out_shape=jax.ShapeDtypeStruct((n_pad, c_out), out_dtype),
        grid=(1,),
        in_specs=[
            pl.BlockSpec((n_pad, n_pad), lambda i: (0, 0)),
            pl.BlockSpec((n_pad, c_in), lambda i: (0, 0)),
            pl.BlockSpec((c_in, c_out), lambda i: (0, 0)),
            pl.BlockSpec((1, c_out), lambda i: (0, 0)),
        ],
        out_specs=pl.BlockSpec((n_pad, c_out), lambda i: (0, 0)),
        compiler_params=pltpu.CompilerParams(vmem_limit_bytes=vmem_limit),
    )(a, h, w, b2d)


# --------------------------------------------------------------------------
# Tiled path, kernel 1: first-layer feature transform  H1 = X @ W1  (bf16).
# --------------------------------------------------------------------------
def _feature_transform_kernel(x_ref, w_ref, o_ref):
    o_ref[...] = jnp.dot(
        x_ref[...], w_ref[...], preferred_element_type=jnp.float32
    ).astype(o_ref.dtype)


def _feature_transform(x_bf16, w_bf16, *, tm, vmem_limit):
    n_pad, c_in = x_bf16.shape
    c_out = w_bf16.shape[1]
    return pl.pallas_call(
        _feature_transform_kernel,
        out_shape=jax.ShapeDtypeStruct((n_pad, c_out), jnp.bfloat16),
        grid=(n_pad // tm,),
        in_specs=[
            pl.BlockSpec((tm, c_in), lambda i: (i, 0)),
            pl.BlockSpec((c_in, c_out), lambda i: (0, 0)),
        ],
        out_specs=pl.BlockSpec((tm, c_out), lambda i: (i, 0)),
        compiler_params=pltpu.CompilerParams(
            dimension_semantics=("parallel",),
            vmem_limit_bytes=vmem_limit,
        ),
    )(x_bf16, w_bf16)


# --------------------------------------------------------------------------
# Tiled path, kernel 2: aggregation  Y = A_hat @ H + b  (+ ReLU), optionally
# fusing the next layer's feature transform  H_next = bf16(Y) @ W_next  into
# the K-finalize step.  grid = (row tiles [parallel], K tiles [arbitrary]).
# H is either fully VMEM-resident (DMA'd once) or streamed per K tile.
# --------------------------------------------------------------------------
def _aggregate_kernel(a_ref, h_ref, b_ref, *rest,
                      apply_relu, fuse_w, h_resident, tk):
    if fuse_w:
        w_ref, o_ref, acc_ref = rest
    else:
        o_ref, acc_ref = rest
        w_ref = None

    k = pl.program_id(1)

    @pl.when(k == 0)
    def _():
        acc_ref[...] = jnp.zeros_like(acc_ref)

    if h_resident:
        off = pl.multiple_of(k * tk, tk)
        h_blk = h_ref[pl.ds(off, tk), :]
    else:
        h_blk = h_ref[...]

    acc_ref[...] += jnp.dot(a_ref[...], h_blk, preferred_element_type=jnp.float32)

    @pl.when(k == pl.num_programs(1) - 1)
    def _():
        y = acc_ref[...] + b_ref[...]
        if apply_relu:
            y = jnp.maximum(y, 0.0)
        if fuse_w:
            y = jnp.dot(y.astype(jnp.bfloat16), w_ref[...],
                        preferred_element_type=jnp.float32)
        o_ref[...] = y.astype(o_ref.dtype)


def _aggregate(a, h, b2d, w_next, *, apply_relu, out_dtype, tm, tk,
               h_resident, vmem_limit):
    n_pad = a.shape[0]
    c_pad = h.shape[1]
    fuse_w = w_next is not None
    c_out = w_next.shape[1] if fuse_w else c_pad

    if h_resident:
        h_spec = pl.BlockSpec((n_pad, c_pad), lambda i, k: (0, 0))  # DMA once
    else:
        h_spec = pl.BlockSpec((tk, c_pad), lambda i, k: (k, 0))

    in_specs = [
        pl.BlockSpec((tm, tk), lambda i, k: (i, k)),       # A_hat tile
        h_spec,                                            # H
        pl.BlockSpec((1, c_pad), lambda i, k: (0, 0)),     # bias
    ]
    args = [a, h, b2d]
    if fuse_w:
        in_specs.append(pl.BlockSpec((c_pad, c_out), lambda i, k: (0, 0)))
        args.append(w_next)

    kernel = functools.partial(_aggregate_kernel, apply_relu=apply_relu,
                               fuse_w=fuse_w, h_resident=h_resident, tk=tk)
    return pl.pallas_call(
        kernel,
        out_shape=jax.ShapeDtypeStruct((n_pad, c_out), out_dtype),
        grid=(n_pad // tm, n_pad // tk),
        in_specs=in_specs,
        out_specs=pl.BlockSpec((tm, c_out), lambda i, k: (i, 0)),
        scratch_shapes=[pltpu.VMEM((tm, c_pad), jnp.float32)],
        compiler_params=pltpu.CompilerParams(
            dimension_semantics=("parallel", "arbitrary"),
            vmem_limit_bytes=vmem_limit,
        ),
    )(*args)


# --------------------------------------------------------------------------
# Planning / host-side preparation
# --------------------------------------------------------------------------
def _make_plan(n, dims, *, force_tiled=False, force_nonresident_h=False):
    vmem = _vmem_limit_bytes()
    cmax = max(_round_up(d, 128) for d in dims)

    n128 = _round_up(n, 128)
    # Single fused block per layer when everything comfortably fits VMEM.
    single_est = (2 * n128 * n128 * 2          # A_hat (bf16, double-buffered)
                  + 4 * n128 * cmax * 2        # H in + out (double-buffered)
                  + 2 * n128 * cmax * 4        # f32 temporaries
                  + 4 * cmax * cmax * 2)       # W
    if not force_tiled and single_est <= int(0.6 * vmem):
        return dict(mode="single", n_pad=n128, vmem=vmem)

    n_pad = _round_up(n, 512)
    tk = 512
    # Keep H fully VMEM-resident when 2 buffers of it use <=1/3 of the budget.
    h_resident = (not force_nonresident_h) and (2 * n_pad * cmax * 2 <= vmem // 3)
    if h_resident:
        # >=2 row tiles so "parallel" can shard across v7x's 2 TensorCores.
        tm = 512 if n_pad // 512 >= 2 else 256
    else:
        # No resident H: bigger row tiles cut the per-row-tile H re-stream.
        if n_pad % 1024 == 0 and n_pad // 1024 >= 2:
            tm = 1024
        elif n_pad // 512 >= 2:
            tm = 512
        else:
            tm = 256
    return dict(mode="tiled", n_pad=n_pad, tm=tm, tk=tk,
                h_resident=h_resident, vmem=vmem)


def prepare_adjacency(a_hat, plan):
    """Pad + narrow A_hat once (N^2 stream) -- cache/reuse across calls."""
    n_pad = plan["n_pad"]
    return _pad2d(a_hat, n_pad, n_pad).astype(jnp.bfloat16)


# --------------------------------------------------------------------------
# Model forward
# --------------------------------------------------------------------------
def gcn_forward(x, a_hat, params, *, force_tiled=False, force_nonresident_h=False):
    """GCN.forward: all-but-last layers get ReLU (+dropout=identity in eval)."""
    n = x.shape[0]
    dims = [x.shape[1]] + [w.shape[1] for w, _ in params]
    plan = _make_plan(n, dims, force_tiled=force_tiled,
                      force_nonresident_h=force_nonresident_h)
    n_pad, vmem = plan["n_pad"], plan["vmem"]
    num_layers = len(params)
    c_out_final = params[-1][0].shape[1]

    a_prep = prepare_adjacency(a_hat, plan)

    w_pads, b_pads = [], []
    for (w, b) in params:
        ci = _round_up(w.shape[0], 128)
        co = _round_up(w.shape[1], 128)
        w_pads.append(_pad2d(w, ci, co).astype(jnp.bfloat16))
        b_pads.append(jnp.pad(b, (0, co - b.shape[0]))
                      .reshape(1, co).astype(jnp.float32))

    x_pad = _pad2d(x, n_pad, _round_up(x.shape[1], 128)).astype(jnp.bfloat16)

    if plan["mode"] == "single":
        h = x_pad
        for li in range(num_layers):
            last = li == num_layers - 1
            h = _layer_single_block(
                a_prep, h, w_pads[li], b_pads[li],
                apply_relu=not last,
                out_dtype=jnp.float32 if last else jnp.bfloat16,
                vmem_limit=vmem)
        return h[:n, :c_out_final]

    # Tiled path: H1 = X @ W1 once; each aggregation then fuses the next
    # layer's feature transform into its finalize step (bf16 intermediates).
    tm, tk, h_res = plan["tm"], plan["tk"], plan["h_resident"]
    h = _feature_transform(x_pad, w_pads[0], tm=tm, vmem_limit=vmem)
    for li in range(num_layers):
        last = li == num_layers - 1
        h = _aggregate(a_prep, h, b_pads[li],
                       None if last else w_pads[li + 1],
                       apply_relu=not last,
                       out_dtype=jnp.float32 if last else jnp.bfloat16,
                       tm=tm, tk=tk, h_resident=h_res, vmem_limit=vmem)
    return h[:n, :c_out_final]


# --------------------------------------------------------------------------
# Test-harness helpers
# --------------------------------------------------------------------------
def glorot(key, shape):
    fan_in, fan_out = shape
    limit = jnp.sqrt(6.0 / (fan_in + fan_out))
    return jax.random.uniform(key, shape, jnp.float32, -limit, limit)


def build_normalized_adjacency(edge_index, num_nodes):
    """Dense D^{-1/2} (A + I) D^{-1/2} from an edge_index [2, E] (int)."""
    src, dst = edge_index[0], edge_index[1]
    a = jnp.zeros((num_nodes, num_nodes), jnp.float32)
    a = a.at[dst, src].set(1.0)                       # row = target node
    a = jnp.maximum(a, jnp.eye(num_nodes, dtype=jnp.float32))
    deg = a.sum(axis=1)
    dinv = jnp.where(deg > 0, 1.0 / jnp.sqrt(deg), 0.0)
    return dinv[:, None] * a * dinv[None, :]


def gcn_reference(x, a_hat, params):
    """Pure-JAX reference mirroring the kernels' mixed precision
    (bf16 MXU operands, f32 accumulation, bf16 intermediate activations)."""
    f32 = jnp.float32
    a = a_hat.astype(jnp.bfloat16).astype(f32)
    h = x.astype(jnp.bfloat16).astype(f32)
    num_layers = len(params)
    for i, (w, b) in enumerate(params):
        wb = w.astype(jnp.bfloat16).astype(f32)
        t = jnp.dot(h, wb).astype(jnp.bfloat16).astype(f32)
        y = jnp.dot(a, t) + b
        if i < num_layers - 1:
            h = jnp.maximum(y, 0.0).astype(jnp.bfloat16).astype(f32)
        else:
            return y


if __name__ == "__main__":
    root = jax.random.PRNGKey(0)

    def run_case(seed, num_nodes, num_edges, in_c, hid_c, out_c, num_layers,
                 **fwd_kw):
        key = jax.random.fold_in(root, seed)
        k_x, k_e, k_p = jax.random.split(key, 3)
        x = jax.random.normal(k_x, (num_nodes, in_c), jnp.float32)
        edge_index = jax.random.randint(k_e, (2, num_edges), 0, num_nodes,
                                        jnp.int32)
        a_hat = build_normalized_adjacency(edge_index, num_nodes)

        dims = [in_c] + [hid_c] * (num_layers - 1) + [out_c]
        keys = jax.random.split(k_p, num_layers)
        params = [(glorot(keys[li], (dims[li], dims[li + 1])),
                   jnp.zeros((dims[li + 1],), jnp.float32))
                  for li in range(num_layers)]

        out = jax.block_until_ready(gcn_forward(x, a_hat, params, **fwd_kw))
        ref = gcn_reference(x, a_hat, params)
        assert out.shape == (num_nodes, out_c), out.shape
        err = float(jnp.max(jnp.abs(out - ref)))
        assert jnp.allclose(out, ref, atol=2e-2, rtol=2e-2), err
        return err

    # 1) Small graph -> fully fused single-block kernel per layer.
    run_case(0, 300, 1200, 16, 64, 8, 3)
    # 2) Tiled path: 512-tiles, VMEM-resident bf16 H, next-layer X@W fused
    #    into the aggregation finalize (2 row tiles -> megacore-friendly).
    run_case(1, 700, 3000, 16, 64, 8, 3, force_tiled=True)
    # 3) Tiled-path fallback without resident H (streams (tk, C) H blocks).
    run_case(2, 700, 3000, 16, 64, 8, 3, force_tiled=True,
             force_nonresident_h=True)

    print("KERNEL_OK")
</pallas_src>

<mosaic_0001>
module attributes {stable_mosaic.version = 11 : i64} {
  func.func @_layer_single_block_kernel(%arg0: i32, %arg1: memref<384x384xbf16, #tpu.memory_space<vmem>>, %arg2: memref<384x128xbf16, #tpu.memory_space<vmem>>, %arg3: memref<128x128xbf16, #tpu.memory_space<vmem>>, %arg4: memref<1x128xf32, #tpu.memory_space<vmem>>, %arg5: memref<384x128xbf16, #tpu.memory_space<vmem>>) attributes {dimension_semantics = [#tpu.dimension_semantics<arbitrary>], iteration_bounds = array<i64: 1>, scalar_prefetch = 0 : i64, scratch_operands = 0 : i64, tpu.core_type = #tpu.core_type<tc>, window_params = [{pipeline_mode = #tpu.pipeline_mode<synchronous>, transform_indices = @transform_0, window_bounds = array<i64: 384, 384>}, {pipeline_mode = #tpu.pipeline_mode<synchronous>, transform_indices = @transform_1, window_bounds = array<i64: 384, 128>}, {pipeline_mode = #tpu.pipeline_mode<synchronous>, transform_indices = @transform_2, window_bounds = array<i64: 128, 128>}, {pipeline_mode = #tpu.pipeline_mode<synchronous>, transform_indices = @transform_3, window_bounds = array<i64: 1, 128>}, {pipeline_mode = #tpu.pipeline_mode<synchronous>, transform_indices = @transform_4, window_bounds = array<i64: 384, 128>}]} {
    %c0 = arith.constant 0 : index
    %c0_0 = arith.constant 0 : index
    %0 = vector.load %arg2[%c0, %c0_0] : memref<384x128xbf16, #tpu.memory_space<vmem>>, vector<384x128xbf16>
    %c0_1 = arith.constant 0 : index
    %c0_2 = arith.constant 0 : index
    %1 = vector.load %arg3[%c0_1, %c0_2] : memref<128x128xbf16, #tpu.memory_space<vmem>>, vector<128x128xbf16>
    %cst = arith.constant dense<0.000000e+00> : vector<384x128xf32>
    %2 = tpu.matmul %0, %1, %cst {dimension_numbers = #tpu.dot_dimension_numbers<[1], [0], [0], [1], [0, 0, 1, 1], [], []>} : vector<384x128xbf16>, vector<128x128xbf16>, vector<384x128xf32> -> vector<384x128xf32>
    %c0_3 = arith.constant 0 : index
    %c0_4 = arith.constant 0 : index
    %3 = vector.load %arg1[%c0_3, %c0_4] : memref<384x384xbf16, #tpu.memory_space<vmem>>, vector<384x384xbf16>
    %4 = arith.truncf %2 : vector<384x128xf32> to vector<384x128xbf16>
    %cst_5 = arith.constant dense<0.000000e+00> : vector<384x128xf32>
    %5 = tpu.matmul %3, %4, %cst_5 {dimension_numbers = #tpu.dot_dimension_numbers<[1], [0], [0], [1], [0, 0, 1, 1], [], []>} : vector<384x384xbf16>, vector<384x128xbf16>, vector<384x128xf32> -> vector<384x128xf32>
    %c0_6 = arith.constant 0 : index
    %c0_7 = arith.constant 0 : index
    %6 = vector.load %arg4[%c0_6, %c0_7] : memref<1x128xf32, #tpu.memory_space<vmem>>, vector<1x128xf32>
    %7 = vector.broadcast %6 : vector<1x128xf32> to vector<384x128xf32>
    %8 = arith.addf %5, %7 : vector<384x128xf32>
    %cst_8 = arith.constant 0.000000e+00 : f32
    %9 = vector.broadcast %cst_8 : f32 to vector<384x128xf32>
    %10 = arith.maximumf %8, %9 : vector<384x128xf32>
    %11 = arith.truncf %10 : vector<384x128xf32> to vector<384x128xbf16>
    %c0_9 = arith.constant 0 : index
    %c0_10 = arith.constant 0 : index
    %12 = vector.load %arg5[%c0_9, %c0_10] : memref<384x128xbf16, #tpu.memory_space<vmem>>, vector<384x128xbf16>
    tpu.vector_store %arg5[%c0_9, %c0_10], %11 {strides = array<i32>} : memref<384x128xbf16, #tpu.memory_space<vmem>>, vector<384x128xbf16>,
    return
  }
  func.func @transform_0(%arg0: i32) -> (i32, i32) {
    %c0_i32 = arith.constant 0 : i32
    %c0_i32_0 = arith.constant 0 : i32
    %c0_i32_1 = arith.constant 0 : i32
    return %c0_i32, %c0_i32_0 : i32, i32
  }
  func.func @transform_1(%arg0: i32) -> (i32, i32) {
    %c0_i32 = arith.constant 0 : i32
    %c0_i32_0 = arith.constant 0 : i32
    %c0_i32_1 = arith.constant 0 : i32
    return %c0_i32, %c0_i32_0 : i32, i32
  }
  func.func @transform_2(%arg0: i32) -> (i32, i32) {
    %c0_i32 = arith.constant 0 : i32
    %c0_i32_0 = arith.constant 0 : i32
    %c0_i32_1 = arith.constant 0 : i32
    return %c0_i32, %c0_i32_0 : i32, i32
  }
  func.func @transform_3(%arg0: i32) -> (i32, i32) {
    %c0_i32 = arith.constant 0 : i32
    %c0_i32_0 = arith.constant 0 : i32
    %c0_i32_1 = arith.constant 0 : i32
    return %c0_i32, %c0_i32_0 : i32, i32
  }
  func.func @transform_4(%arg0: i32) -> (i32, i32) {
    %c0_i32 = arith.constant 0 : i32
    %c0_i32_0 = arith.constant 0 : i32
    %c0_i32_1 = arith.constant 0 : i32
    return %c0_i32, %c0_i32_0 : i32, i32
  }
}

</mosaic_0001>

<bundles_post_ra>
// kernel: tpu_custom_call.1
= control target key start
LH: loop header
LB: loop body
LE: loop exit
PB: predicated region body
PF: predicated region fallthrough
CT: control target
= control target key end

     0   :  { %9 = vsyncpa [#allocation3], 0  ;;  %s2786_s0 = inlined_call_operand.hbm [shape: bf16[384,384], index: 0, kind: input, shape index: {}]   ;;  %s2787_s1 = inlined_call_operand.hbm [shape: bf16[384,128], index: 1, kind: input, shape index: {}]   ;;  %s2788_s2 = inlined_call_operand.hbm [shape: bf16[128,128], index: 2, kind: input, shape index: {}]   ;;  %s2789_s3 = inlined_call_operand.vmem [shape: f32[1,128], index: 3, kind: input, shape index: {}]   ;;  %s2790_s4 = inlined_call_operand.hbm [shape: bf16[384,128], index: 4, kind: output, shape index: {}]  }
   0x1   :  { %10 = vsyncpa [#allocation6], 0 }
   0x2   :  { %11 = vsyncpa [#allocation4], 0  ;;  %s2575_s15 = smov [#allocation5]   ;;  %s2481_s19 = scalar_lea.hbm %s2787_s1, 3072 }
   0x3   :  { %s29_s16 = sshll.u32 %s2575_s15, 4  ;;  %p2482_p0 = scmp.ne.s32.totalorder %s2787_s1, %s2481_s19  ;;  %s30_s16 = int_to_ptr.vmem [resolvable:$true] %s29_s16 }
   0x4   :  { %p2485_p1 = scmp.lt.u32.totalorder %s2481_s19, %s2787_s1 }
   0x6   :  { %p2487_p2 = pnand %p2485_p1, %p2482_p0 }
   0x8   :  { %2490 = shalt.err (!%p2487_p2)
}
   0x9   :  { %s2491_s24 = scalar_lea.vmem %s30_s16, 3072  ;;  %p2496_p4 = scmp.lt.s32.totalorder %s30_s16, %s30_s16 }
   0xa   :  { %p2492_p3 = scmp.ne.s32.totalorder %s30_s16, %s2491_s24  ;;  %p2497_p5 = scmp.lt.s32.totalorder %s2491_s24, %s2491_s24 }
   0xc   :  { %p2498_p6 = por %p2497_p5, %p2496_p4 }
   0xe   :  { %p2499_p7 = pnand %p2498_p6, %p2492_p3 }
  0x10   :  { %2502 = shalt.err (!%p2499_p7)
}
  0x11   :  { %s2576_s25 = smov 64   ;;  %s2577_s26 = smov 4  }
  0x12   :  { %35 = dma.hbm_to_vmem [thread:$0]  %s2787_s1, 3072, %s30_s16, [#allocation6], %s2576_s25, %s2576_s25, %s2577_s26  }
  0x13   :  { %s2578_s29 = smov [#allocation2]   ;;  %s2503_s7 = scalar_lea.hbm %s2786_s0, 9216 }
  0x14   :  { %s17_s30 = sshll.u32 %s2578_s29, 4  ;;  %p2504_p8 = scmp.ne.s32.totalorder %s2786_s0, %s2503_s7  ;;  %s18_s30 = int_to_ptr.vmem [resolvable:$true] %s17_s30 }
  0x15   :  { %p2507_p9 = scmp.lt.u32.totalorder %s2503_s7, %s2786_s0 }
  0x17   :  { %p2509_p10 = pnand %p2507_p9, %p2504_p8 }
  0x19   :  { %2512 = shalt.err (!%p2509_p10)
}
  0x1a   :  { %s2513_s12 = scalar_lea.vmem %s18_s30, 9216  ;;  %p2518_p12 = scmp.lt.s32.totalorder %s18_s30, %s18_s30 }
  0x1b   :  { %p2514_p11 = scmp.ne.s32.totalorder %s18_s30, %s2513_s12  ;;  %p2519_p13 = scmp.lt.s32.totalorder %s2513_s12, %s2513_s12 }
  0x1d   :  { %p2520_p0 = por %p2519_p13, %p2518_p12 }
  0x1f   :  { %p2521_p1 = pnand %p2520_p0, %p2514_p11 }
  0x21   :  { %2524 = shalt.err (!%p2521_p1)
}
  0x22   :  { %s2579_s1 = smov 192   ;;  %s2580_s13 = smov 12  }
  0x23   :  { %23 = dma.hbm_to_vmem [thread:$0]  %s2786_s0, 9216, %s18_s30, [#allocation3], %s2579_s1, %s2579_s1, %s2580_s13  }
  0x24   :  { %s2581_s16 = smov [#allocation7]   ;;  %s2525_s20 = scalar_lea.hbm %s2788_s2, 1024 }
  0x25   :  { %s41_s17 = sshll.u32 %s2581_s16, 4  ;;  %p2526_p2 = scmp.ne.s32.totalorder %s2788_s2, %s2525_s20  ;;  %s42_s17 = int_to_ptr.vmem [resolvable:$true] %s41_s17 }
  0x26   :  { %p2529_p3 = scmp.lt.u32.totalorder %s2525_s20, %s2788_s2 }
  0x28   :  { %p2531_p4 = pnand %p2529_p3, %p2526_p2 }
  0x2a   :  { %2534 = shalt.err (!%p2531_p4)
}
  0x2b   :  { %s2535_s27 = scalar_lea.vmem %s42_s17, 1024  ;;  %p2540_p6 = scmp.lt.s32.totalorder %s42_s17, %s42_s17 }
  0x2c   :  { %p2536_p5 = scmp.ne.s32.totalorder %s42_s17, %s2535_s27  ;;  %p2541_p7 = scmp.lt.s32.totalorder %s2535_s27, %s2535_s27 }
  0x2e   :  { %p2542_p8 = por %p2541_p7, %p2540_p6 }
  0x30   :  { %p2543_p9 = pnand %p2542_p8, %p2536_p5 }
  0x32   :  { %2546 = shalt.err (!%p2543_p9)
}
  0x33   :  { %47 = dma.hbm_to_vmem [thread:$0]  %s2788_s2, 1024, %s42_s17, [#allocation6], %s2576_s25, %s2576_s25, %s2577_s26  }
  0x34   :  { %2569 = dma.done.wait [#allocation3], 9216  }
  0x35   :  { %2570 = vsyncadd [#allocation3], 4294958080 }
  0x36   :  { %2571 = dma.done.wait [#allocation6], 4096  }
  0x37   :  { %2572 = vsyncadd [#allocation6], 4294963200  ;;  %v2353_v0 = vld [vmem:[#allocation7] sm:$0xff]   ;;  %v2354_v1 = vld [vmem:[#allocation7 + $0x8] sm:$0xff]   ;;  %v2582_v32 = vmov 0  }
  0x38   :  { %2216 = vmatprep.subr.bf16.mxu0 %v2353_v0  ;;  %v2355_v2 = vld [vmem:[#allocation7 + $0x10] sm:$0xff]   ;;  %v2356_v3 = vld [vmem:[#allocation7 + $0x18] sm:$0xff]   ;;  %v2361_v4 = vld [vmem:[#allocation5] sm:$0xff]   ;;  %1052 = vmatprep.subr.bf16.mxu1 %v2582_v32 }
  0x39   :  { %2217 = vmatpush3.bf16.msra.mxu0 %v2353_v0  ;;  %2232 = vmatprep.mubr.bf16.mxu0 %v2361_v4  ;;  %v2357_v5 = vld [vmem:[#allocation7 + $0x20] sm:$0xff]   ;;  %v2358_v6 = vld [vmem:[#allocation7 + $0x28] sm:$0xff]   ;;  %v2359_v7 = vld [vmem:[#allocation7 + $0x30] sm:$0xff]  }
  0x3a   :  { %2218 = vmatprep.subr.bf16.mxu0 %v2354_v1  ;;  %v2360_v8 = vld [vmem:[#allocation7 + $0x38] sm:$0xff]   ;;  %v2362_v9 = vld [vmem:[#allocation5 + $0x8] sm:$0xff]   ;;  %v2363_v10 = vld [vmem:[#allocation5 + $0x10] sm:$0xff]  }
  0x3b   :  { %v2364_v11 = vld [vmem:[#allocation5 + $0x18] sm:$0xff]   ;;  %v2365_v12 = vld [vmem:[#allocation5 + $0x20] sm:$0xff]   ;;  %v2366_v13 = vld [vmem:[#allocation5 + $0x28] sm:$0xff]  }
  0x3c   :  { %v2367_v14 = vld [vmem:[#allocation5 + $0x30] sm:$0xff]   ;;  %v2368_v15 = vld [vmem:[#allocation5 + $0x38] sm:$0xff]   ;;  %v2369_v16 = vld [vmem:[#allocation5 + $0x40] sm:$0xff]  }
  0x3d   :  { %2219 = vmatpush3.bf16.msra.mxu0 %v2354_v1  ;;  %v2370_v17 = vld [vmem:[#allocation5 + $0x48] sm:$0xff]   ;;  %v2371_v18 = vld [vmem:[#allocation5 + $0x50] sm:$0xff]   ;;  %v2372_v19 = vld [vmem:[#allocation5 + $0x58] sm:$0xff]  }
  0x3e   :  { %2220 = vmatprep.subr.bf16.mxu0 %v2355_v2  ;;  %v2373_v20 = vld [vmem:[#allocation5 + $0x60] sm:$0xff]   ;;  %v2374_v21 = vld [vmem:[#allocation5 + $0x68] sm:$0xff]   ;;  %v2375_v22 = vld [vmem:[#allocation5 + $0x70] sm:$0xff]  }
  0x3f   :  { %v2376_v23 = vld [vmem:[#allocation5 + $0x78] sm:$0xff]   ;;  %v2377_v24 = vld [vmem:[#allocation5 + $0x80] sm:$0xff]   ;;  %v2378_v25 = vld [vmem:[#allocation5 + $0x88] sm:$0xff]  }
  0x40   :  { %v2379_v26 = vld [vmem:[#allocation5 + $0x90] sm:$0xff]   ;;  %v2380_v27 = vld [vmem:[#allocation5 + $0x98] sm:$0xff]   ;;  %v2381_v28 = vld [vmem:[#allocation5 + $0xa0] sm:$0xff]  }
  0x41   :  { %2221 = vmatpush3.bf16.msra.mxu0 %v2355_v2  ;;  %v2382_v29 = vld [vmem:[#allocation5 + $0xa8] sm:$0xff]   ;;  %v2383_v30 = vld [vmem:[#allocation5 + $0xb0] sm:$0xff]   ;;  %v2384_v31 = vld [vmem:[#allocation5 + $0xb8] sm:$0xff]  }
  0x42   :  { %2222 = vmatprep.subr.bf16.mxu0 %v2356_v3  ;;  %v2387_v33 = vld [vmem:[#allocation2 + $0x4] ss:$12 sps:$4 sm:$0xff]   ;;  %v2400_v34 = vld [vmem:[#allocation2 + $0x8] ss:$12 sps:$4 sm:$0xff]  }
  0x43   :  { %1084 = vmatprep.mubr.bf16.mxu1 %v2387_v33 }
  0x45   :  { %2223 = vmatpush3.bf16.msra.mxu0 %v2356_v3 }
  0x46   :  { %2224 = vmatprep.subr.bf16.mxu0 %v2357_v5 }
  0x49   :  { %2225 = vmatpush3.bf16.msra.mxu0 %v2357_v5 }
  0x4a   :  { %2226 = vmatprep.subr.bf16.mxu0 %v2358_v6 }
  0x4d   :  { %2227 = vmatpush3.bf16.msra.mxu0 %v2358_v6 }
  0x4e   :  { %2228 = vmatprep.subr.bf16.mxu0 %v2359_v7 }
  0x51   :  { %2229 = vmatpush3.bf16.msra.mxu0 %v2359_v7 }
  0x52   :  { %2230 = vmatprep.subr.bf16.mxu0 %v2360_v8 }
  0x55   :  { %2231 = vmatpush3.bf16.msra.mxu0 %v2360_v8 }
  0x58   :  { %2233 = vmatmul.mubr.bf16.vlgmr.msra.gmra.mrb[0].mxu0 %v2362_v9 }
  0x59   :  { %2236 = vmatprep.mubr.bf16.mxu0 %v2363_v10 }
  0x60   :  { %2237 = vmatmul.mubr.bf16.gmra.mrb[4].mxu0 %v2364_v11 }
  0x61   :  { %2240 = vmatprep.mubr.bf16.mxu0 %v2365_v12 }
  0x68   :  { %2241 = vmatmul.mubr.bf16.gmra.mrb[8].mxu0 %v2366_v13 }
  0x69   :  { %2244 = vmatprep.mubr.bf16.mxu0 %v2367_v14 }
  0x70   :  { %2245 = vmatmul.mubr.bf16.gmra.mrb[12].mxu0 %v2368_v15 }
  0x71   :  { %2248 = vmatprep.mubr.bf16.mxu0 %v2369_v16 }
  0x78   :  { %2249 = vmatmul.mubr.bf16.gmra.mrb[16].mxu0 %v2370_v17 }
  0x79   :  { %2252 = vmatprep.mubr.bf16.mxu0 %v2371_v18 }
  0x80   :  { %2253 = vmatmul.mubr.bf16.gmra.mrb[20].mxu0 %v2372_v19 }
  0x81   :  { %2256 = vmatprep.mubr.bf16.mxu0 %v2373_v20 }
  0x88   :  { %2257 = vmatmul.mubr.bf16.gmra.mrb[24].mxu0 %v2374_v21  ;;  %v2385_v21 = vld [vmem:[#allocation2] ss:$12 sps:$4 sm:$0xff]  }
  0x89   :  { %2260 = vmatprep.mubr.bf16.mxu0 %v2375_v22 }
  0x90   :  { %2261 = vmatmul.mubr.bf16.gmra.mrb[28].mxu0 %v2376_v23  ;;  %v2388_v23 = vld [vmem:[#allocation2 + $0x1c] ss:$12 sps:$4 sm:$0xff]  }
  0x91   :  { %2264 = vmatprep.mubr.bf16.mxu0 %v2377_v24 }
  0x98   :  { %2265 = vmatmul.mubr.bf16.gmra.mrb[32].mxu0 %v2378_v25 }
  0x99   :  { %2268 = vmatprep.mubr.bf16.mxu0 %v2379_v26 }
  0xa0   :  { %2269 = vmatmul.mubr.bf16.gmra.mrb[36].mxu0 %v2380_v27 }
  0xa1   :  { %2272 = vmatprep.mubr.bf16.mxu0 %v2381_v28 }
  0xa8   :  { %2273 = vmatmul.mubr.bf16.gmra.mrb[40].mxu0 %v2382_v29  ;;  %v2390_v29 = vld [vmem:[#allocation2 + $0x18] ss:$12 sps:$4 sm:$0xff]  }
  0xa9   :  { %2276 = vmatprep.mubr.bf16.mxu0 %v2383_v30 }
  0xb0   :  { %2277 = vmatmul.mubr.bf16.gmra.mrb[44].mxu0 %v2384_v31  ;;  %v2391_v31 = vld [vmem:[#allocation2 + $0x34] ss:$12 sps:$4 sm:$0xff]  }
  0xb1   :  { %2296 = vmatprep.mubr.bf16.mxu0 %v2400_v34 }
 0x12b   :  { %v2234_v35 = vpop.f32.mrb[0].mxu0 }
 0x12c   :  { %v350_v36 = vpop.f32.mrb[1].mxu0 }
 0x12d   :  { %v2235_v37 = vpop.f32.mrb[2].mxu0 }
 0x12e   :  { %v638_v38 = vpack.c.bf16 %v2235_v37, %v2234_v35  ;;  %v353_v39 = vpop.f32.mrb[3].mxu0  ;;  %v2393_v37 = vld [vmem:[#allocation2 + $0x30] ss:$12 sps:$4 sm:$0xff]  }
 0x12f   :  { %v637_v40 = vpack.c.bf16 %v353_v39, %v350_v36  ;;  %v2394_v39 = vld [vmem:[#allocation2 + $0x4c] ss:$12 sps:$4 sm:$0xff]  }
 0x131   :  { %1053 = vmatpush1.bf16.msra.mxu1 %v637_v40 }
 0x132   :  { %1054 = vmatprep.subr.bf16.mxu1 %v2582_v32 }
 0x133   :  { %v2238_v41 = vpop.f32.mrb[4].mxu0 }
 0x134   :  { %v366_v42 = vpop.f32.mrb[5].mxu0 }
 0x135   :  { %v2239_v43 = vpop.f32.mrb[6].mxu0  ;;  %1055 = vmatpush1.bf16.msra.mxu1 %v638_v38 }
 0x136   :  { %v640_v44 = vpack.c.bf16 %v2239_v43, %v2238_v41  ;;  %v369_v45 = vpop.f32.mrb[7].mxu0  ;;  %1056 = vmatprep.subr.bf16.mxu1 %v2582_v32 }
 0x137   :  { %v639_v46 = vpack.c.bf16 %v369_v45, %v366_v42  ;;  %v2396_v45 = vld [vmem:[#allocation2 + $0x48] ss:$12 sps:$4 sm:$0xff]  }
 0x139   :  { %1057 = vmatpush1.bf16.msra.mxu1 %v639_v46 }
 0x13a   :  { %1058 = vmatprep.subr.bf16.mxu1 %v2582_v32 }
 0x13b   :  { %v2242_v47 = vpop.f32.mrb[8].mxu0 }
 0x13c   :  { %v382_v48 = vpop.f32.mrb[9].mxu0 }
 0x13d   :  { %v2243_v49 = vpop.f32.mrb[10].mxu0  ;;  %1059 = vmatpush1.bf16.msra.mxu1 %v640_v44 }
 0x13e   :  { %v642_v50 = vpack.c.bf16 %v2243_v49, %v2242_v47  ;;  %v385_v51 = vpop.f32.mrb[11].mxu0  ;;  %1060 = vmatprep.subr.bf16.mxu1 %v2582_v32  ;;  %v2397_v47 = vld [vmem:[#allocation2 + $0x64] ss:$12 sps:$4 sm:$0xff]  }
 0x13f   :  { %v641_v52 = vpack.c.bf16 %v385_v51, %v382_v48  ;;  %v2399_v51 = vld [vmem:[#allocation2 + $0x60] ss:$12 sps:$4 sm:$0xff]  }
 0x141   :  { %1061 = vmatpush1.bf16.msra.mxu1 %v641_v52  ;;  %v2401_v52 = vld [vmem:[#allocation2 + $0x20] ss:$12 sps:$4 sm:$0xff]  }
 0x142   :  { %1062 = vmatprep.subr.bf16.mxu1 %v2582_v32 }
 0x143   :  { %v2246_v53 = vpop.f32.mrb[12].mxu0 }
 0x144   :  { %v398_v54 = vpop.f32.mrb[13].mxu0 }
 0x145   :  { %v2247_v55 = vpop.f32.mrb[14].mxu0  ;;  %1063 = vmatpush1.bf16.msra.mxu1 %v642_v50 }
 0x146   :  { %v644_v56 = vpack.c.bf16 %v2247_v55, %v2246_v53  ;;  %v401_v57 = vpop.f32.mrb[15].mxu0  ;;  %1064 = vmatprep.subr.bf16.mxu1 %v2582_v32  ;;  %v2402_v53 = vld [vmem:[#allocation2 + $0x7c] ss:$12 sps:$4 sm:$0xff]   ;;  %v2404_v55 = vld [vmem:[#allocation2 + $0x78] ss:$12 sps:$4 sm:$0xff]  }
 0x147   :  { %v643_v58 = vpack.c.bf16 %v401_v57, %v398_v54  ;;  %v2405_v54 = vld [vmem:[#allocation2 + $0x38] ss:$12 sps:$4 sm:$0xff]   ;;  %v2407_v57 = vld [vmem:[#allocation2 + $0x94] ss:$12 sps:$4 sm:$0xff]  }
 0x149   :  { %1065 = vmatpush1.bf16.msra.mxu1 %v643_v58  ;;  %v2410_v58 = vld [vmem:[#allocation2 + $0x68] ss:$12 sps:$4 sm:$0xff]  }
 0x14a   :  { %1066 = vmatprep.subr.bf16.mxu1 %v2582_v32 }
 0x14b   :  { %v2250_v59 = vpop.f32.mrb[16].mxu0 }
 0x14c   :  { %v414_v60 = vpop.f32.mrb[17].mxu0 }
 0x14d   :  { %v2251_v61 = vpop.f32.mrb[18].mxu0  ;;  %1067 = vmatpush1.bf16.msra.mxu1 %v644_v56  ;;  %v2406_v56 = vld [vmem:[#allocation2 + $0x50] ss:$12 sps:$4 sm:$0xff]  }
 0x14e   :  { %v646_v62 = vpack.c.bf16 %v2251_v61, %v2250_v59  ;;  %v417_v63 = vpop.f32.mrb[19].mxu0  ;;  %1068 = vmatprep.subr.bf16.mxu1 %v2582_v32  ;;  %v2409_v59 = vld [vmem:[#allocation2 + $0x90] ss:$12 sps:$4 sm:$0xff]   ;;  %v2412_v61 = vld [vmem:[#allocation2 + $0xac] ss:$12 sps:$4 sm:$0xff]  }
 0x14f   :  { %v645_v0 = vpack.c.bf16 %v417_v63, %v414_v60  ;;  %v2411_v60 = vld [vmem:[#allocation2 + $0x80] ss:$12 sps:$4 sm:$0xff]   ;;  %v2414_v63 = vld [vmem:[#allocation2 + $0xa8] ss:$12 sps:$4 sm:$0xff]  }
 0x151   :  { %1069 = vmatpush1.bf16.msra.mxu1 %v645_v0  ;;  %v2416_v0 = vld [vmem:[#allocation2 + $0xb0] ss:$12 sps:$4 sm:$0xff]  }
 0x152   :  { %1070 = vmatprep.subr.bf16.mxu1 %v2582_v32 }
 0x153   :  { %v2254_v1 = vpop.f32.mrb[20].mxu0 }
 0x154   :  { %v430_v2 = vpop.f32.mrb[21].mxu0 }
 0x155   :  { %v2255_v3 = vpop.f32.mrb[22].mxu0  ;;  %1071 = vmatpush1.bf16.msra.mxu1 %v646_v62  ;;  %v2415_v62 = vld [vmem:[#allocation2 + $0x98] ss:$12 sps:$4 sm:$0xff]  }
 0x156   :  { %v648_v4 = vpack.c.bf16 %v2255_v3, %v2254_v1  ;;  %v433_v5 = vpop.f32.mrb[23].mxu0  ;;  %1072 = vmatprep.subr.bf16.mxu1 %v2582_v32  ;;  %v2417_v1 = vld [vmem:[#allocation2 + $0xc4] ss:$12 sps:$4 sm:$0xff]   ;;  %v2419_v3 = vld [vmem:[#allocation2 + $0xc0] ss:$12 sps:$4 sm:$0xff]  }
 0x157   :  { %v647_v6 = vpack.c.bf16 %v433_v5, %v430_v2  ;;  %v2420_v2 = vld [vmem:[#allocation2 + $0xc8] ss:$12 sps:$4 sm:$0xff]  }
 0x158   :  { %v2422_v5 = vld [vmem:[#allocation2 + $0xdc] ss:$12 sps:$4 sm:$0xff]  }
 0x159   :  { %1073 = vmatpush1.bf16.msra.mxu1 %v647_v6  ;;  %v2428_v6 = vld [vmem:[#allocation2 + $0xf8] ss:$12 sps:$4 sm:$0xff]  }
 0x15a   :  { %1074 = vmatprep.subr.bf16.mxu1 %v2582_v32 }
 0x15b   :  { %v2258_v7 = vpop.f32.mrb[24].mxu0 }
 0x15c   :  { %v446_v8 = vpop.f32.mrb[25].mxu0 }
 0x15d   :  { %v2259_v9 = vpop.f32.mrb[26].mxu0  ;;  %1075 = vmatpush1.bf16.msra.mxu1 %v648_v4  ;;  %v2421_v4 = vld [vmem:[#allocation2 + $0xe0] ss:$12 sps:$4 sm:$0xff]  }
 0x15e   :  { %v650_v10 = vpack.c.bf16 %v2259_v9, %v2258_v7  ;;  %v449_v11 = vpop.f32.mrb[27].mxu0  ;;  %1076 = vmatprep.subr.bf16.mxu1 %v2582_v32  ;;  %v2424_v7 = vld [vmem:[#allocation2 + $0xd8] ss:$12 sps:$4 sm:$0xff]   ;;  %v2429_v9 = vld [vmem:[#allocation2 + $0x110] ss:$12 sps:$4 sm:$0xff]  }
 0x15f   :  { %v649_v12 = vpack.c.bf16 %v449_v11, %v446_v8  ;;  %v2425_v8 = vld [vmem:[#allocation2 + $0xf4] ss:$12 sps:$4 sm:$0xff]   ;;  %v2427_v11 = vld [vmem:[#allocation2 + $0xf0] ss:$12 sps:$4 sm:$0xff]  }
 0x161   :  { %1077 = vmatpush1.bf16.msra.mxu1 %v649_v12  ;;  %v2430_v12 = vld [vmem:[#allocation2 + $0x10c] ss:$12 sps:$4 sm:$0xff]  }
 0x162   :  { %1078 = vmatprep.subr.bf16.mxu1 %v2582_v32 }
 0x163   :  { %v2262_v13 = vpop.f32.mrb[28].mxu0 }
 0x164   :  { %v462_v14 = vpop.f32.mrb[29].mxu0 }
 0x165   :  { %v2263_v15 = vpop.f32.mrb[30].mxu0  ;;  %1079 = vmatpush1.bf16.msra.mxu1 %v650_v10  ;;  %v2436_v10 = vld [vmem:[#allocation2 + $0x128] ss:$12 sps:$4 sm:$0xff]  }
 0x166   :  { %v652_v16 = vpack.c.bf16 %v2263_v15, %v2262_v13  ;;  %v465_v17 = vpop.f32.mrb[31].mxu0  ;;  %1080 = vmatprep.subr.bf16.mxu1 %v2582_v32  ;;  %v2437_v13 = vld [vmem:[#allocation2 + $0x140] ss:$12 sps:$4 sm:$0xff]   ;;  %v2432_v15 = vld [vmem:[#allocation2 + $0x108] ss:$12 sps:$4 sm:$0xff]  }
 0x167   :  { %v651_v18 = vpack.c.bf16 %v465_v17, %v462_v14  ;;  %v2444_v14 = vld [vmem:[#allocation2 + $0x158] ss:$12 sps:$4 sm:$0xff]   ;;  %v2445_v17 = vld [vmem:[#allocation2 + $0x170] ss:$12 sps:$4 sm:$0xff]  }
 0x169   :  { %1081 = vmatpush1.bf16.msra.mxu1 %v651_v18  ;;  %v2452_v18 = vld [vmem:[#allocation2 + $0x188] ss:$12 sps:$4 sm:$0xff]  }
 0x16a   :  { %1082 = vmatprep.subr.bf16.mxu1 %v2582_v32 }
 0x16b   :  { %v2266_v19 = vpop.f32.mrb[32].mxu0 }
 0x16c   :  { %v478_v20 = vpop.f32.mrb[33].mxu0 }
 0x16d   :  { %v2267_v22 = vpop.f32.mrb[34].mxu0  ;;  %1083 = vmatpush1.bf16.msra.mxu1 %v652_v16  ;;  %v2433_v16 = vld [vmem:[#allocation2 + $0x124] ss:$12 sps:$4 sm:$0xff]  }
 0x16e   :  { %v654_v24 = vpack.c.bf16 %v2267_v22, %v2266_v19  ;;  %v481_v25 = vpop.f32.mrb[35].mxu0  ;;  %v2435_v19 = vld [vmem:[#allocation2 + $0x120] ss:$12 sps:$4 sm:$0xff]   ;;  %v2460_v22 = vld [vmem:[#allocation2 + $0x1b8] ss:$12 sps:$4 sm:$0xff]  }
 0x16f   :  { %v653_v26 = vpack.c.bf16 %v481_v25, %v478_v20  ;;  %v2438_v20 = vld [vmem:[#allocation2 + $0x13c] ss:$12 sps:$4 sm:$0xff]  }
 0x170   :  { %1085 = vmatmul.mubr.bf16.vlgmr.msra.gmra.mrb[0].mxu1 %v2385_v21  ;;  %v2453_v21 = vld [vmem:[#allocation2 + $0x1a0] ss:$12 sps:$4 sm:$0xff]   ;;  %v2461_v25 = vld [vmem:[#allocation2 + $0x1d0] ss:$12 sps:$4 sm:$0xff]  }
 0x171   :  { %2280 = vmatprep.subr.bf16.mxu0 %v653_v26  ;;  %1092 = vmatprep.mubr.bf16.mxu1 %v2388_v23  ;;  %v2440_v23 = vld [vmem:[#allocation2 + $0x138] ss:$12 sps:$4 sm:$0xff]  }
 0x172   :  { %2281 = vmatpush3.bf16.msra.mxu0 %v653_v26  ;;  %v2468_v26 = vld [vmem:[#allocation2 + $0x1e8] ss:$12 sps:$4 sm:$0xff]  }
 0x173   :  { %v2270_v27 = vpop.f32.mrb[36].mxu0  ;;  %2282 = vmatprep.subr.bf16.mxu0 %v654_v24 }
 0x174   :  { %v494_v28 = vpop.f32.mrb[37].mxu0 }
 0x175   :  { %v2271_v30 = vpop.f32.mrb[38].mxu0 }
 0x176   :  { %v656_v32 = vpack.c.bf16 %v2271_v30, %v2270_v27  ;;  %v497_v33 = vpop.f32.mrb[39].mxu0  ;;  %2283 = vmatpush3.bf16.msra.mxu0 %v654_v24  ;;  %v2441_v24 = vld [vmem:[#allocation2 + $0x154] ss:$12 sps:$4 sm:$0xff]   ;;  %v2443_v27 = vld [vmem:[#allocation2 + $0x150] ss:$12 sps:$4 sm:$0xff]  }
 0x177   :  { %v655_v34 = vpack.c.bf16 %v497_v33, %v494_v28  ;;  %v2446_v28 = vld [vmem:[#allocation2 + $0x16c] ss:$12 sps:$4 sm:$0xff]   ;;  %v2477_v33 = vld [vmem:[#allocation2 + $0x230] ss:$12 sps:$4 sm:$0xff]  }
 0x178   :  { %1093 = vmatmul.mubr.bf16.gmra.mrb[4].mxu1 %v2390_v29  ;;  %v2469_v29 = vld [vmem:[#allocation2 + $0x200] ss:$12 sps:$4 sm:$0xff]   ;;  %v2476_v30 = vld [vmem:[#allocation2 + $0x218] ss:$12 sps:$4 sm:$0xff]  }
 0x179   :  { %2284 = vmatprep.subr.bf16.mxu0 %v655_v34  ;;  %1100 = vmatprep.mubr.bf16.mxu1 %v2391_v31  ;;  %v2448_v31 = vld [vmem:[#allocation2 + $0x168] ss:$12 sps:$4 sm:$0xff]  }
 0x17a   :  { %2285 = vmatpush3.bf16.msra.mxu0 %v655_v34  ;;  %v2451_v34 = vld [vmem:[#allocation2 + $0x180] ss:$12 sps:$4 sm:$0xff]  }
 0x17b   :  { %v2274_v35 = vpop.f32.mrb[40].mxu0  ;;  %2286 = vmatprep.subr.bf16.mxu0 %v656_v32 }
 0x17c   :  { %v510_v36 = vpop.f32.mrb[41].mxu0 }
 0x17d   :  { %v2275_v38 = vpop.f32.mrb[42].mxu0 }
 0x17e   :  { %v658_v40 = vpack.c.bf16 %v2275_v38, %v2274_v35  ;;  %v513_v41 = vpop.f32.mrb[43].mxu0  ;;  %2287 = vmatpush3.bf16.msra.mxu0 %v656_v32  ;;  %v2449_v32 = vld [vmem:[#allocation2 + $0x184] ss:$12 sps:$4 sm:$0xff]   ;;  %v2454_v35 = vld [vmem:[#allocation2 + $0x19c] ss:$12 sps:$4 sm:$0xff]  }
 0x17f   :  { %v657_v42 = vpack.c.bf16 %v513_v41, %v510_v36  ;;  %v2456_v36 = vld [vmem:[#allocation2 + $0x198] ss:$12 sps:$4 sm:$0xff]   ;;  %v2459_v38 = vld [vmem:[#allocation2 + $0x1b0] ss:$12 sps:$4 sm:$0xff]  }
 0x180   :  { %1101 = vmatmul.mubr.bf16.gmra.mrb[8].mxu1 %v2393_v37  ;;  %v2457_v37 = vld [vmem:[#allocation2 + $0x1b4] ss:$12 sps:$4 sm:$0xff]   ;;  %v2465_v41 = vld [vmem:[#allocation2 + $0x1e4] ss:$12 sps:$4 sm:$0xff]  }
 0x181   :  { %2288 = vmatprep.subr.bf16.mxu0 %v657_v42  ;;  %1108 = vmatprep.mubr.bf16.mxu1 %v2394_v39  ;;  %v2462_v39 = vld [vmem:[#allocation2 + $0x1cc] ss:$12 sps:$4 sm:$0xff]  }
 0x182   :  { %2289 = vmatpush3.bf16.msra.mxu0 %v657_v42  ;;  %v2467_v42 = vld [vmem:[#allocation2 + $0x1e0] ss:$12 sps:$4 sm:$0xff]  }
 0x183   :  { %v2278_v43 = vpop.f32.mrb[44].mxu0  ;;  %2290 = vmatprep.subr.bf16.mxu0 %v658_v40 }
 0x184   :  { %v526_v44 = vpop.f32.mrb[45].mxu0 }
 0x185   :  { %v2279_v46 = vpop.f32.mrb[46].mxu0 }
 0x186   :  { %v660_v48 = vpack.c.bf16 %v2279_v46, %v2278_v43  ;;  %v529_v49 = vpop.f32.mrb[47].mxu0  ;;  %2291 = vmatpush3.bf16.msra.mxu0 %v658_v40  ;;  %v2464_v40 = vld [vmem:[#allocation2 + $0x1c8] ss:$12 sps:$4 sm:$0xff]   ;;  %v2475_v46 = vld [vmem:[#allocation2 + $0x210] ss:$12 sps:$4 sm:$0xff]  }
 0x187   :  { %v659_v50 = vpack.c.bf16 %v529_v49, %v526_v44  ;;  %v2470_v43 = vld [vmem:[#allocation2 + $0x1fc] ss:$12 sps:$4 sm:$0xff]   ;;  %v2472_v44 = vld [vmem:[#allocation2 + $0x1f8] ss:$12 sps:$4 sm:$0xff]  }
 0x188   :  { %1109 = vmatmul.mubr.bf16.gmra.mrb[12].mxu1 %v2396_v45  ;;  %v2473_v45 = vld [vmem:[#allocation2 + $0x214] ss:$12 sps:$4 sm:$0xff]  }
 0x189   :  { %2292 = vmatprep.subr.bf16.mxu0 %v659_v50  ;;  %1116 = vmatprep.mubr.bf16.mxu1 %v2397_v47  ;;  %v2478_v47 = vld [vmem:[#allocation2 + $0x22c] ss:$12 sps:$4 sm:$0xff]  }
 0x18a   :  { %2293 = vmatpush3.bf16.msra.mxu0 %v659_v50 }
 0x18b   :  { %2294 = vmatprep.subr.bf16.mxu0 %v660_v48 }
 0x18e   :  { %2295 = vmatpush3.bf16.msra.mxu0 %v660_v48  ;;  %v2480_v48 = vld [vmem:[#allocation2 + $0x228] ss:$12 sps:$4 sm:$0xff]  }
 0x190   :  { %1117 = vmatmul.mubr.bf16.gmra.mrb[16].mxu1 %v2399_v51 }
 0x191   :  { %2297 = vmatmul.mubr.bf16.vlgmr.msra.gmra.mrb[48].mxu0 %v2401_v52  ;;  %1124 = vmatprep.mubr.bf16.mxu1 %v2402_v53 }
 0x192   :  { %2300 = vmatprep.mubr.bf16.mxu0 %v2405_v54 }
 0x198   :  { %1125 = vmatmul.mubr.bf16.gmra.mrb[20].mxu1 %v2404_v55 }
 0x199   :  { %2301 = vmatmul.mubr.bf16.gmra.mrb[52].mxu0 %v2406_v56  ;;  %1132 = vmatprep.mubr.bf16.mxu1 %v2407_v57 }
 0x19a   :  { %2304 = vmatprep.mubr.bf16.mxu0 %v2410_v58 }
 0x1a0   :  { %1133 = vmatmul.mubr.bf16.gmra.mrb[24].mxu1 %v2409_v59 }
 0x1a1   :  { %2305 = vmatmul.mubr.bf16.gmra.mrb[56].mxu0 %v2411_v60  ;;  %1140 = vmatprep.mubr.bf16.mxu1 %v2412_v61 }
 0x1a2   :  { %2308 = vmatprep.mubr.bf16.mxu0 %v2415_v62 }
 0x1a8   :  { %1141 = vmatmul.mubr.bf16.gmra.mrb[28].mxu1 %v2414_v63 }
 0x1a9   :  { %2309 = vmatmul.mubr.bf16.gmra.mrb[60].mxu0 %v2416_v0  ;;  %1148 = vmatprep.mubr.bf16.mxu1 %v2417_v1  ;;  %v2670_v1 = vld [vmem:[%s2789_s3] ss:$0 sm:$0xff]  ;;  %s2583_s3 = smov [#allocation8]  }
 0x1aa   :  { %2312 = vmatprep.mubr.bf16.mxu0 %v2420_v2  ;;  %s1795_s30 = sshll.u32 %s2583_s3, 4  ;;  %s1796_s30 = int_to_ptr.vmem [resolvable:$true] %s1795_s30 }
 0x1ab   :  { %s2547_s5 = scalar_lea.vmem %s1796_s30, 3072  ;;  %p2552_p11 = scmp.lt.s32.totalorder %s1796_s30, %s1796_s30 }
 0x1ac   :  { %p2548_p10 = scmp.ne.s32.totalorder %s1796_s30, %s2547_s5  ;;  %p2553_p12 = scmp.lt.s32.totalorder %s2547_s5, %s2547_s5 }
 0x1ae   :  { %p2554_p13 = por %p2553_p12, %p2552_p11 }
 0x1b0   :  { %1149 = vmatmul.mubr.bf16.gmra.mrb[32].mxu1 %v2419_v3  ;;  %p2555_p0 = pnand %p2554_p13, %p2548_p10 }
 0x1b1   :  { %2313 = vmatmul.mubr.bf16.gmra.mrb[64].mxu0 %v2421_v4  ;;  %1156 = vmatprep.mubr.bf16.mxu1 %v2422_v5 }
 0x1b2   :  { %2316 = vmatprep.mubr.bf16.mxu0 %v2428_v6 }
 0x1b8   :  { %1157 = vmatmul.mubr.bf16.gmra.mrb[36].mxu1 %v2424_v7 }
 0x1b9   :  { %1164 = vmatprep.mubr.bf16.mxu1 %v2425_v8  ;;  %2317 = vmatmul.mubr.bf16.gmra.mrb[68].mxu0 %v2429_v9 }
 0x1ba   :  { %2320 = vmatprep.mubr.bf16.mxu0 %v2436_v10 }
 0x1c0   :  { %1165 = vmatmul.mubr.bf16.gmra.mrb[40].mxu1 %v2427_v11 }
 0x1c1   :  { %1172 = vmatprep.mubr.bf16.mxu1 %v2430_v12  ;;  %2321 = vmatmul.mubr.bf16.gmra.mrb[72].mxu0 %v2437_v13 }
 0x1c2   :  { %2324 = vmatprep.mubr.bf16.mxu0 %v2444_v14 }
 0x1c8   :  { %1173 = vmatmul.mubr.bf16.gmra.mrb[44].mxu1 %v2432_v15 }
 0x1c9   :  { %1180 = vmatprep.mubr.bf16.mxu1 %v2433_v16  ;;  %2325 = vmatmul.mubr.bf16.gmra.mrb[76].mxu0 %v2445_v17 }
 0x1ca   :  { %2328 = vmatprep.mubr.bf16.mxu0 %v2452_v18 }
 0x1d0   :  { %1181 = vmatmul.mubr.bf16.gmra.mrb[48].mxu1 %v2435_v19 }
 0x1d1   :  { %1188 = vmatprep.mubr.bf16.mxu1 %v2438_v20  ;;  %2329 = vmatmul.mubr.bf16.gmra.mrb[80].mxu0 %v2453_v21 }
 0x1d2   :  { %2332 = vmatprep.mubr.bf16.mxu0 %v2460_v22 }
 0x1d8   :  { %1189 = vmatmul.mubr.bf16.gmra.mrb[52].mxu1 %v2440_v23 }
 0x1d9   :  { %1196 = vmatprep.mubr.bf16.mxu1 %v2441_v24  ;;  %2333 = vmatmul.mubr.bf16.gmra.mrb[84].mxu0 %v2461_v25 }
 0x1da   :  { %2336 = vmatprep.mubr.bf16.mxu0 %v2468_v26 }
 0x1e0   :  { %1197 = vmatmul.mubr.bf16.gmra.mrb[56].mxu1 %v2443_v27 }
 0x1e1   :  { %1204 = vmatprep.mubr.bf16.mxu1 %v2446_v28  ;;  %2337 = vmatmul.mubr.bf16.gmra.mrb[88].mxu0 %v2469_v29 }
 0x1e2   :  { %2340 = vmatprep.mubr.bf16.mxu0 %v2476_v30 }
 0x1e8   :  { %1205 = vmatmul.mubr.bf16.gmra.mrb[60].mxu1 %v2448_v31 }
 0x1e9   :  { %1212 = vmatprep.mubr.bf16.mxu1 %v2449_v32  ;;  %2341 = vmatmul.mubr.bf16.gmra.mrb[92].mxu0 %v2477_v33 }
 0x1f0   :  { %1213 = vmatmul.mubr.bf16.gmra.mrb[64].mxu1 %v2451_v34 }
 0x1f1   :  { %1220 = vmatprep.mubr.bf16.mxu1 %v2454_v35 }
 0x1f8   :  { %1221 = vmatmul.mubr.bf16.gmra.mrb[68].mxu1 %v2456_v36 }
 0x1f9   :  { %1228 = vmatprep.mubr.bf16.mxu1 %v2457_v37 }
 0x200   :  { %1229 = vmatmul.mubr.bf16.gmra.mrb[72].mxu1 %v2459_v38 }
 0x201   :  { %1236 = vmatprep.mubr.bf16.mxu1 %v2462_v39 }
 0x208   :  { %1237 = vmatmul.mubr.bf16.gmra.mrb[76].mxu1 %v2464_v40 }
 0x209   :  { %1244 = vmatprep.mubr.bf16.mxu1 %v2465_v41 }
 0x210   :  { %1245 = vmatmul.mubr.bf16.gmra.mrb[80].mxu1 %v2467_v42 }
 0x211   :  { %1252 = vmatprep.mubr.bf16.mxu1 %v2470_v43 }
 0x218   :  { %1253 = vmatmul.mubr.bf16.gmra.mrb[84].mxu1 %v2472_v44 }
 0x219   :  { %1260 = vmatprep.mubr.bf16.mxu1 %v2473_v45 }
 0x220   :  { %1261 = vmatmul.mubr.bf16.gmra.mrb[88].mxu1 %v2475_v46 }
 0x221   :  { %1268 = vmatprep.mubr.bf16.mxu1 %v2478_v47 }
 0x228   :  { %1269 = vmatmul.mubr.bf16.gmra.mrb[92].mxu1 %v2480_v48 }
 0x243   :  { %v1086_v49 = vpop.f32.mrb[0].mxu1 }
 0x244   :  { %v1088_v50 = vpop.f32.mrb[1].mxu1  ;;  %v1087_v4 = vadd.f32 %v2670_v1, %v1086_v49 }
 0x245   :  { %v1089_v51 = vpop.f32.mrb[2].mxu1 }
 0x246   :  { %v1091_v52 = vpop.f32.mrb[3].mxu1  ;;  %v1090_v11 = vadd.f32 %v2670_v1, %v1089_v51 }
 0x24b   :  { %v1094_v53 = vpop.f32.mrb[4].mxu1 }
 0x24c   :  { %v1096_v54 = vpop.f32.mrb[5].mxu1  ;;  %v1095_v2 = vadd.f32 %v2670_v1, %v1094_v53 }
 0x24d   :  { %v1097_v55 = vpop.f32.mrb[6].mxu1 }
 0x24e   :  { %v1099_v56 = vpop.f32.mrb[7].mxu1  ;;  %v1098_v7 = vadd.f32 %v2670_v1, %v1097_v55 }
 0x253   :  { %v1102_v57 = vpop.f32.mrb[8].mxu1 }
 0x254   :  { %v1104_v58 = vpop.f32.mrb[9].mxu1  ;;  %v1103_v25 = vadd.f32 %v2670_v1, %v1102_v57 }
 0x255   :  { %v1105_v59 = vpop.f32.mrb[10].mxu1 }
 0x256   :  { %v1107_v60 = vpop.f32.mrb[11].mxu1  ;;  %v1106_v33 = vadd.f32 %v2670_v1, %v1105_v59 }
 0x25b   :  { %v1110_v61 = vpop.f32.mrb[12].mxu1 }
 0x25c   :  { %v1112_v62 = vpop.f32.mrb[13].mxu1  ;;  %v1111_v22 = vadd.f32 %v2670_v1, %v1110_v61 }
 0x25d   :  { %v1113_v63 = vpop.f32.mrb[14].mxu1 }
 0x25e   :  { %v1115_v0 = vpop.f32.mrb[15].mxu1  ;;  %v1114_v29 = vadd.f32 %v2670_v1, %v1113_v63 }
 0x263   :  { %v1118_v3 = vpop.f32.mrb[16].mxu1 }
 0x264   :  { %v1120_v5 = vpop.f32.mrb[17].mxu1  ;;  %v2298_v6 = vpop.f32.mrb[48].mxu0  ;;  %v1119_v47 = vadd.f32 %v2670_v1, %v1118_v3 }
 0x265   :  { %v1320_v8 = vadd.f32 %v2298_v6, %v1095_v2  ;;  %v1121_v9 = vpop.f32.mrb[18].mxu1  ;;  %v1311_v10 = vpop.f32.mrb[49].mxu0 }
 0x266   :  { %v1312_v12 = vadd.f32 %v1311_v10, %v1087_v4  ;;  %v1123_v13 = vpop.f32.mrb[19].mxu1  ;;  %v2299_v14 = vpop.f32.mrb[50].mxu0  ;;  %v1122_v55 = vadd.f32 %v2670_v1, %v1121_v9 }
 0x267   :  { %v1323_v15 = vadd.f32 %v2299_v14, %v1098_v7  ;;  %v1314_v16 = vpop.f32.mrb[51].mxu0  ;;  %v1504_v18 = vmax.f32 %v1320_v8, 0.0 }
 0x268   :  { %v1315_v17 = vadd.f32 %v1314_v16, %v1090_v11  ;;  %v1502_v20 = vmax.f32 %v1312_v12, 0.0 }
 0x269   :  { %v1505_v19 = vmax.f32 %v1323_v15, 0.0 }
 0x26a   :  { %v1503_v21 = vmax.f32 %v1315_v17, 0.0 }
 0x26b   :  { %v2017_v23 = vpack.c.bf16 %v1505_v19, %v1504_v18  ;;  %v1126_v24 = vpop.f32.mrb[20].mxu1 }
 0x26c   :  { %v2012_v26 = vpack.c.bf16 %v1503_v21, %v1502_v20  ;;  %v1128_v27 = vpop.f32.mrb[21].mxu1  ;;  %v2302_v28 = vpop.f32.mrb[52].mxu0  ;;  %v1127_v44 = vadd.f32 %v2670_v1, %v1126_v24 }
 0x26d   :  { %2129 = vst [vmem:[#allocation8 + $0x8] sm:$0xff] %v2017_v23   ;;  %v1336_v30 = vadd.f32 %v2302_v28, %v1111_v22  ;;  %v1129_v31 = vpop.f32.mrb[22].mxu1  ;;  %v1327_v32 = vpop.f32.mrb[53].mxu0 }
 0x26e   :  { %2013 = vst [vmem:[#allocation8] sm:$0xff] %v2012_v26   ;;  %v1328_v34 = vadd.f32 %v1327_v32, %v1103_v25  ;;  %v1131_v35 = vpop.f32.mrb[23].mxu1  ;;  %v2303_v36 = vpop.f32.mrb[54].mxu0  ;;  %v1130_v51 = vadd.f32 %v2670_v1, %v1129_v31 }
 0x26f   :  { %v1339_v37 = vadd.f32 %v2303_v36, %v1114_v29  ;;  %v1330_v38 = vpop.f32.mrb[55].mxu0  ;;  %v1508_v40 = vmax.f32 %v1336_v30, 0.0 }
 0x270   :  { %v1331_v39 = vadd.f32 %v1330_v38, %v1106_v33  ;;  %v1506_v42 = vmax.f32 %v1328_v34, 0.0 }
 0x271   :  { %v1509_v41 = vmax.f32 %v1339_v37, 0.0 }
 0x272   :  { %v1507_v43 = vmax.f32 %v1331_v39, 0.0 }
 0x273   :  { %v2027_v45 = vpack.c.bf16 %v1509_v41, %v1508_v40  ;;  %v1134_v46 = vpop.f32.mrb[24].mxu1 }
 0x274   :  { %v2022_v48 = vpack.c.bf16 %v1507_v43, %v1506_v42  ;;  %v1136_v49 = vpop.f32.mrb[25].mxu1  ;;  %v2306_v50 = vpop.f32.mrb[56].mxu0  ;;  %v1135_v5 = vadd.f32 %v2670_v1, %v1134_v46 }
 0x275   :  { %2131 = vst [vmem:[#allocation8 + $0x18] sm:$0xff] %v2027_v45   ;;  %v1352_v52 = vadd.f32 %v2306_v50, %v1127_v44  ;;  %v1137_v53 = vpop.f32.mrb[26].mxu1  ;;  %v1343_v54 = vpop.f32.mrb[57].mxu0 }
 0x276   :  { %2130 = vst [vmem:[#allocation8 + $0x10] sm:$0xff] %v2022_v48   ;;  %v1344_v56 = vadd.f32 %v1343_v54, %v1119_v47  ;;  %v1139_v57 = vpop.f32.mrb[27].mxu1  ;;  %v2307_v58 = vpop.f32.mrb[58].mxu0  ;;  %v1138_v12 = vadd.f32 %v2670_v1, %v1137_v53 }
 0x277   :  { %v1355_v59 = vadd.f32 %v2307_v58, %v1130_v51  ;;  %v1346_v60 = vpop.f32.mrb[59].mxu0  ;;  %v1512_v62 = vmax.f32 %v1352_v52, 0.0 }
 0x278   :  { %v1347_v61 = vadd.f32 %v1346_v60, %v1122_v55  ;;  %v1510_v0 = vmax.f32 %v1344_v56, 0.0 }
 0x279   :  { %v1513_v63 = vmax.f32 %v1355_v59, 0.0 }
 0x27a   :  { %v1511_v2 = vmax.f32 %v1347_v61, 0.0 }
 0x27b   :  { %v2037_v3 = vpack.c.bf16 %v1513_v63, %v1512_v62  ;;  %v1142_v4 = vpop.f32.mrb[28].mxu1 }
 0x27c   :  { %v2032_v6 = vpack.c.bf16 %v1511_v2, %v1510_v0  ;;  %v1143_v7 = vadd.f32 %v2670_v1, %v1142_v4  ;;  %v1144_v8 = vpop.f32.mrb[29].mxu1  ;;  %v2310_v9 = vpop.f32.mrb[60].mxu0 }
 0x27d   :  { %2133 = vst [vmem:[#allocation8 + $0x28] sm:$0xff] %v2037_v3   ;;  %v1145_v10 = vpop.f32.mrb[30].mxu1  ;;  %v1359_v11 = vpop.f32.mrb[61].mxu0 }
 0x27e   :  { %2132 = vst [vmem:[#allocation8 + $0x20] sm:$0xff] %v2032_v6   ;;  %v1368_v13 = vadd.f32 %v2310_v9, %v1143_v7  ;;  %v1146_v14 = vadd.f32 %v2670_v1, %v1145_v10  ;;  %v1360_v15 = vadd.f32 %v1359_v11, %v1135_v5  ;;  %v1147_v16 = vpop.f32.mrb[31].mxu1  ;;  %v2311_v17 = vpop.f32.mrb[62].mxu0 }
 0x27f   :  { %v1362_v18 = vpop.f32.mrb[63].mxu0 }
 0x280   :  { %v1371_v19 = vadd.f32 %v2311_v17, %v1146_v14  ;;  %v1363_v20 = vadd.f32 %v1362_v18, %v1138_v12  ;;  %v1516_v21 = vmax.f32 %v1368_v13, 0.0  ;;  %v1514_v22 = vmax.f32 %v1360_v15, 0.0 }
 0x282   :  { %v1517_v23 = vmax.f32 %v1371_v19, 0.0  ;;  %v1515_v24 = vmax.f32 %v1363_v20, 0.0 }
 0x283   :  { %v1150_v25 = vpop.f32.mrb[32].mxu1 }
 0x284   :  { %v2047_v26 = vpack.c.bf16 %v1517_v23, %v1516_v21  ;;  %v2042_v27 = vpack.c.bf16 %v1515_v24, %v1514_v22  ;;  %v1151_v28 = vadd.f32 %v2670_v1, %v1150_v25  ;;  %v1152_v29 = vpop.f32.mrb[33].mxu1  ;;  %v2314_v30 = vpop.f32.mrb[64].mxu0 }
 0x285   :  { %v1153_v31 = vpop.f32.mrb[34].mxu1  ;;  %v1375_v32 = vpop.f32.mrb[65].mxu0 }
 0x286   :  { %2135 = vst [vmem:[#allocation8 + $0x38] sm:$0xff] %v2047_v26   ;;  %2134 = vst [vmem:[#allocation8 + $0x30] sm:$0xff] %v2042_v27   ;;  %v1154_v33 = vadd.f32 %v2670_v1, %v1153_v31  ;;  %v1376_v34 = vadd.f32 %v1375_v32, %v1151_v28  ;;  %v1155_v35 = vpop.f32.mrb[35].mxu1  ;;  %v2315_v36 = vpop.f32.mrb[66].mxu0 }
 0x287   :  { %v1378_v37 = vpop.f32.mrb[67].mxu0 }
 0x288   :  { %v1379_v38 = vadd.f32 %v1378_v37, %v1154_v33  ;;  %v1518_v39 = vmax.f32 %v1376_v34, 0.0 }
 0x28a   :  { %v1519_v40 = vmax.f32 %v1379_v38, 0.0 }
 0x28b   :  { %v1158_v41 = vpop.f32.mrb[36].mxu1 }
 0x28c   :  { %v2052_v42 = vpack.c.bf16 %v1519_v40, %v1518_v39  ;;  %v1159_v43 = vadd.f32 %v2670_v1, %v1158_v41  ;;  %v1160_v44 = vpop.f32.mrb[37].mxu1  ;;  %v2318_v45 = vpop.f32.mrb[68].mxu0 }
 0x28d   :  { %v1161_v46 = vpop.f32.mrb[38].mxu1  ;;  %v1391_v47 = vpop.f32.mrb[69].mxu0 }
 0x28e   :  { %2136 = vst [vmem:[#allocation8 + $0x40] sm:$0xff] %v2052_v42   ;;  %v1384_v48 = vadd.f32 %v2314_v30, %v1159_v43  ;;  %v1162_v49 = vadd.f32 %v2670_v1, %v1161_v46  ;;  %v1163_v50 = vpop.f32.mrb[39].mxu1  ;;  %v2319_v51 = vpop.f32.mrb[70].mxu0 }
 0x28f   :  { %v1394_v52 = vpop.f32.mrb[71].mxu0 }
 0x290   :  { %v1387_v53 = vadd.f32 %v2315_v36, %v1162_v49  ;;  %v1520_v54 = vmax.f32 %v1384_v48, 0.0 }
 0x292   :  { %v1521_v55 = vmax.f32 %v1387_v53, 0.0 }
 0x293   :  { %v1166_v56 = vpop.f32.mrb[40].mxu1 }
 0x294   :  { %v2057_v57 = vpack.c.bf16 %v1521_v55, %v1520_v54  ;;  %v1167_v58 = vadd.f32 %v2670_v1, %v1166_v56  ;;  %v1168_v59 = vpop.f32.mrb[41].mxu1  ;;  %v2322_v60 = vpop.f32.mrb[72].mxu0 }
 0x295   :  { %v1169_v61 = vpop.f32.mrb[42].mxu1  ;;  %v1407_v62 = vpop.f32.mrb[73].mxu0 }
 0x296   :  { %2137 = vst [vmem:[#allocation8 + $0x48] sm:$0xff] %v2057_v57   ;;  %v1170_v63 = vadd.f32 %v2670_v1, %v1169_v61  ;;  %v1392_v0 = vadd.f32 %v1391_v47, %v1167_v58  ;;  %v1171_v2 = vpop.f32.mrb[43].mxu1  ;;  %v2323_v3 = vpop.f32.mrb[74].mxu0 }
 0x297   :  { %v1410_v4 = vpop.f32.mrb[75].mxu0 }
 0x298   :  { %v1395_v5 = vadd.f32 %v1394_v52, %v1170_v63  ;;  %v1522_v6 = vmax.f32 %v1392_v0, 0.0 }
 0x29a   :  { %v1523_v7 = vmax.f32 %v1395_v5, 0.0 }
 0x29b   :  { %v1174_v8 = vpop.f32.mrb[44].mxu1 }
 0x29c   :  { %v2062_v9 = vpack.c.bf16 %v1523_v7, %v1522_v6  ;;  %v1175_v10 = vadd.f32 %v2670_v1, %v1174_v8  ;;  %v1176_v11 = vpop.f32.mrb[45].mxu1  ;;  %v2695_v12 = vpop.f32.mrb[76].mxu0 }
 0x29d   :  { %v1177_v13 = vpop.f32.mrb[46].mxu1  ;;  %v1423_v14 = vpop.f32.mrb[77].mxu0 }
 0x29e   :  { %2138 = vst [vmem:[#allocation8 + $0x50] sm:$0xff] %v2062_v9   ;;  %v1400_v15 = vadd.f32 %v2318_v45, %v1175_v10  ;;  %v1178_v16 = vadd.f32 %v2670_v1, %v1177_v13  ;;  %v1179_v17 = vpop.f32.mrb[47].mxu1  ;;  %v2698_v18 = vpop.f32.mrb[78].mxu0 }
 0x29f   :  { %v1426_v19 = vpop.f32.mrb[79].mxu0 }
 0x2a0   :  { %v1403_v20 = vadd.f32 %v2319_v51, %v1178_v16  ;;  %v1524_v21 = vmax.f32 %v1400_v15, 0.0 }
 0x2a2   :  { %v1525_v22 = vmax.f32 %v1403_v20, 0.0 }
 0x2a3   :  { %v1182_v23 = vpop.f32.mrb[48].mxu1 }
 0x2a4   :  { %v2067_v24 = vpack.c.bf16 %v1525_v22, %v1524_v21  ;;  %v1183_v25 = vadd.f32 %v2670_v1, %v1182_v23  ;;  %v1184_v26 = vpop.f32.mrb[49].mxu1  ;;  %v2701_v27 = vpop.f32.mrb[80].mxu0 }
 0x2a5   :  { %v1185_v28 = vpop.f32.mrb[50].mxu1  ;;  %v2703_v29 = vpop.f32.mrb[81].mxu0 }
 0x2a6   :  { %2139 = vst [vmem:[#allocation8 + $0x58] sm:$0xff] %v2067_v24   ;;  %v1186_v30 = vadd.f32 %v2670_v1, %v1185_v28  ;;  %v1408_v31 = vadd.f32 %v1407_v62, %v1183_v25  ;;  %v1187_v32 = vpop.f32.mrb[51].mxu1  ;;  %v2706_v33 = vpop.f32.mrb[82].mxu0 }
 0x2a7   :  { %v1442_v34 = vpop.f32.mrb[83].mxu0 }
 0x2a8   :  { %v1411_v35 = vadd.f32 %v1410_v4, %v1186_v30  ;;  %v1526_v36 = vmax.f32 %v1408_v31, 0.0 }
 0x2aa   :  { %v1527_v37 = vmax.f32 %v1411_v35, 0.0 }
 0x2ab   :  { %v1190_v38 = vpop.f32.mrb[52].mxu1 }
 0x2ac   :  { %v2072_v39 = vpack.c.bf16 %v1527_v37, %v1526_v36  ;;  %v1191_v40 = vadd.f32 %v2670_v1, %v1190_v38  ;;  %v1192_v41 = vpop.f32.mrb[53].mxu1  ;;  %v2709_v42 = vpop.f32.mrb[84].mxu0 }
 0x2ad   :  { %v1193_v43 = vpop.f32.mrb[54].mxu1  ;;  %v2711_v44 = vpop.f32.mrb[85].mxu0 }
 0x2ae   :  { %2140 = vst [vmem:[#allocation8 + $0x60] sm:$0xff] %v2072_v39   ;;  %v1416_v45 = vadd.f32 %v2322_v60, %v1191_v40  ;;  %v1194_v46 = vadd.f32 %v2670_v1, %v1193_v43  ;;  %v1195_v47 = vpop.f32.mrb[55].mxu1  ;;  %v2714_v48 = vpop.f32.mrb[86].mxu0 }
 0x2af   :  { %v2716_v49 = vpop.f32.mrb[87].mxu0 }
 0x2b0   :  { %v1419_v50 = vadd.f32 %v2323_v3, %v1194_v46  ;;  %v1528_v51 = vmax.f32 %v1416_v45, 0.0 }
 0x2b2   :  { %v1529_v52 = vmax.f32 %v1419_v50, 0.0 }
 0x2b3   :  { %v1198_v53 = vpop.f32.mrb[56].mxu1 }
 0x2b4   :  { %v2077_v54 = vpack.c.bf16 %v1529_v52, %v1528_v51  ;;  %v1199_v55 = vadd.f32 %v2670_v1, %v1198_v53  ;;  %v1200_v56 = vpop.f32.mrb[57].mxu1  ;;  %v2719_v57 = vpop.f32.mrb[88].mxu0 }
 0x2b5   :  { %v1201_v58 = vpop.f32.mrb[58].mxu1  ;;  %v2721_v59 = vpop.f32.mrb[89].mxu0 }
 0x2b6   :  { %2141 = vst [vmem:[#allocation8 + $0x68] sm:$0xff] %v2077_v54   ;;  %v1202_v60 = vadd.f32 %v2670_v1, %v1201_v58  ;;  %v1424_v61 = vadd.f32 %v1423_v14, %v1199_v55  ;;  %v1203_v62 = vpop.f32.mrb[59].mxu1  ;;  %v2724_v63 = vpop.f32.mrb[90].mxu0 }
 0x2b7   :  { %v2726_v0 = vpop.f32.mrb[91].mxu0 }
 0x2b8   :  { %v1427_v2 = vadd.f32 %v1426_v19, %v1202_v60  ;;  %v1530_v3 = vmax.f32 %v1424_v61, 0.0 }
 0x2ba   :  { %v1531_v4 = vmax.f32 %v1427_v2, 0.0 }
 0x2bb   :  { %v1206_v5 = vpop.f32.mrb[60].mxu1 }
 0x2bc   :  { %v2082_v6 = vpack.c.bf16 %v1531_v4, %v1530_v3  ;;  %v1207_v7 = vadd.f32 %v2670_v1, %v1206_v5  ;;  %v1208_v8 = vpop.f32.mrb[61].mxu1  ;;  %v2729_v9 = vpop.f32.mrb[92].mxu0 }
 0x2bd   :  { %v1209_v10 = vpop.f32.mrb[62].mxu1  ;;  %v2731_v11 = vpop.f32.mrb[93].mxu0 }
 0x2be   :  { %2142 = vst [vmem:[#allocation8 + $0x70] sm:$0xff] %v2082_v6   ;;  %v1432_v13 = vadd.f32 %v2695_v12, %v1207_v7  ;;  %v1210_v14 = vadd.f32 %v2670_v1, %v1209_v10  ;;  %v1211_v15 = vpop.f32.mrb[63].mxu1  ;;  %v2735_v16 = vpop.f32.mrb[94].mxu0 }
 0x2bf   :  { %v2737_v17 = vpop.f32.mrb[95].mxu0 }
 0x2c0   :  { %v1435_v19 = vadd.f32 %v2698_v18, %v1210_v14  ;;  %v1532_v20 = vmax.f32 %v1432_v13, 0.0 }
 0x2c2   :  { %v1533_v21 = vmax.f32 %v1435_v19, 0.0 }
 0x2c3   :  { %v1214_v22 = vpop.f32.mrb[64].mxu1 }
 0x2c4   :  { %v2087_v23 = vpack.c.bf16 %v1533_v21, %v1532_v20  ;;  %v1215_v24 = vadd.f32 %v2670_v1, %v1214_v22  ;;  %v1216_v25 = vpop.f32.mrb[65].mxu1 }
 0x2c5   :  { %v1217_v26 = vpop.f32.mrb[66].mxu1 }
 0x2c6   :  { %2143 = vst [vmem:[#allocation8 + $0x78] sm:$0xff] %v2087_v23   ;;  %v1218_v12 = vadd.f32 %v2670_v1, %v1217_v26  ;;  %v1440_v28 = vadd.f32 %v2703_v29, %v1215_v24  ;;  %v1219_v30 = vpop.f32.mrb[67].mxu1 }
 0x2c8   :  { %v1443_v31 = vadd.f32 %v1442_v34, %v1218_v12  ;;  %v1534_v32 = vmax.f32 %v1440_v28, 0.0 }
 0x2ca   :  { %v1535_v35 = vmax.f32 %v1443_v31, 0.0 }
 0x2cb   :  { %v1222_v36 = vpop.f32.mrb[68].mxu1 }
 0x2cc   :  { %v2092_v37 = vpack.c.bf16 %v1535_v35, %v1534_v32  ;;  %v1223_v18 = vadd.f32 %v2670_v1, %v1222_v36  ;;  %v1224_v38 = vpop.f32.mrb[69].mxu1 }
 0x2cd   :  { %v1225_v39 = vpop.f32.mrb[70].mxu1 }
 0x2ce   :  { %2144 = vst [vmem:[#allocation8 + $0x80] sm:$0xff] %v2092_v37   ;;  %v1448_v40 = vadd.f32 %v2701_v27, %v1223_v18  ;;  %v1226_v41 = vadd.f32 %v2670_v1, %v1225_v39  ;;  %v1227_v43 = vpop.f32.mrb[71].mxu1 }
 0x2d0   :  { %v1451_v45 = vadd.f32 %v2706_v33, %v1226_v41  ;;  %v1536_v46 = vmax.f32 %v1448_v40, 0.0 }
 0x2d2   :  { %v1537_v29 = vmax.f32 %v1451_v45, 0.0 }
 0x2d3   :  { %v1230_v47 = vpop.f32.mrb[72].mxu1 }
 0x2d4   :  { %v2097_v34 = vpack.c.bf16 %v1537_v29, %v1536_v46  ;;  %v1231_v50 = vadd.f32 %v2670_v1, %v1230_v47  ;;  %v1232_v51 = vpop.f32.mrb[73].mxu1 }
 0x2d5   :  { %v1233_v52 = vpop.f32.mrb[74].mxu1 }
 0x2d6   :  { %2145 = vst [vmem:[#allocation8 + $0x88] sm:$0xff] %v2097_v34   ;;  %v1234_v53 = vadd.f32 %v2670_v1, %v1233_v52  ;;  %v1456_v54 = vadd.f32 %v2711_v44, %v1231_v50  ;;  %v1235_v55 = vpop.f32.mrb[75].mxu1 }
 0x2d8   :  { %v1459_v27 = vadd.f32 %v2716_v49, %v1234_v53  ;;  %v1538_v56 = vmax.f32 %v1456_v54, 0.0 }
 0x2da   :  { %v1539_v58 = vmax.f32 %v1459_v27, 0.0 }
 0x2db   :  { %v1238_v60 = vpop.f32.mrb[76].mxu1 }
 0x2dc   :  { %v2102_v33 = vpack.c.bf16 %v1539_v58, %v1538_v56  ;;  %v1239_v61 = vadd.f32 %v2670_v1, %v1238_v60  ;;  %v1240_v62 = vpop.f32.mrb[77].mxu1 }
 0x2dd   :  { %v1241_v2 = vpop.f32.mrb[78].mxu1 }
 0x2de   :  { %2146 = vst [vmem:[#allocation8 + $0x90] sm:$0xff] %v2102_v33   ;;  %v1464_v3 = vadd.f32 %v2709_v42, %v1239_v61  ;;  %v1242_v4 = vadd.f32 %v2670_v1, %v1241_v2  ;;  %v1243_v5 = vpop.f32.mrb[79].mxu1 }
 0x2e0   :  { %v1467_v6 = vadd.f32 %v2714_v48, %v1242_v4  ;;  %v1540_v44 = vmax.f32 %v1464_v3, 0.0 }
 0x2e2   :  { %v1541_v7 = vmax.f32 %v1467_v6, 0.0 }
 0x2e3   :  { %v1246_v8 = vpop.f32.mrb[80].mxu1 }
 0x2e4   :  { %v2107_v49 = vpack.c.bf16 %v1541_v7, %v1540_v44  ;;  %v1247_v10 = vadd.f32 %v2670_v1, %v1246_v8  ;;  %v1248_v13 = vpop.f32.mrb[81].mxu1 }
 0x2e5   :  { %v1249_v14 = vpop.f32.mrb[82].mxu1 }
 0x2e6   :  { %2147 = vst [vmem:[#allocation8 + $0x98] sm:$0xff] %v2107_v49   ;;  %v1250_v15 = vadd.f32 %v2670_v1, %v1249_v14  ;;  %v1472_v19 = vadd.f32 %v2721_v59, %v1247_v10  ;;  %v1251_v20 = vpop.f32.mrb[83].mxu1 }
 0x2e8   :  { %v1475_v42 = vadd.f32 %v2726_v0, %v1250_v15  ;;  %v1542_v21 = vmax.f32 %v1472_v19, 0.0 }
 0x2ea   :  { %v1543_v22 = vmax.f32 %v1475_v42, 0.0 }
 0x2eb   :  { %v1254_v23 = vpop.f32.mrb[84].mxu1 }
 0x2ec   :  { %v2112_v48 = vpack.c.bf16 %v1543_v22, %v1542_v21  ;;  %v1255_v24 = vadd.f32 %v2670_v1, %v1254_v23  ;;  %v1256_v25 = vpop.f32.mrb[85].mxu1 }
 0x2ed   :  { %v1257_v26 = vpop.f32.mrb[86].mxu1 }
 0x2ee   :  { %2148 = vst [vmem:[#allocation8 + $0xa0] sm:$0xff] %v2112_v48   ;;  %v1480_v12 = vadd.f32 %v2719_v57, %v1255_v24  ;;  %v1258_v28 = vadd.f32 %v2670_v1, %v1257_v26  ;;  %v1259_v30 = vpop.f32.mrb[87].mxu1 }
 0x2f0   :  { %v1483_v31 = vadd.f32 %v2724_v63, %v1258_v28  ;;  %v1544_v59 = vmax.f32 %v1480_v12, 0.0 }
 0x2f2   :  { %v1545_v32 = vmax.f32 %v1483_v31, 0.0 }
 0x2f3   :  { %v1262_v35 = vpop.f32.mrb[88].mxu1 }
 0x2f4   :  { %v2117_v0 = vpack.c.bf16 %v1545_v32, %v1544_v59  ;;  %v1263_v36 = vadd.f32 %v2670_v1, %v1262_v35  ;;  %v1264_v37 = vpop.f32.mrb[89].mxu1 }
 0x2f5   :  { %v1265_v18 = vpop.f32.mrb[90].mxu1 }
 0x2f6   :  { %2149 = vst [vmem:[#allocation8 + $0xa8] sm:$0xff] %v2117_v0   ;;  %v1266_v38 = vadd.f32 %v2670_v1, %v1265_v18  ;;  %v1488_v39 = vadd.f32 %v2731_v11, %v1263_v36  ;;  %v1267_v40 = vpop.f32.mrb[91].mxu1 }
 0x2f8   :  { %v1491_v57 = vadd.f32 %v2737_v17, %v1266_v38  ;;  %v1546_v41 = vmax.f32 %v1488_v39, 0.0 }
 0x2fa   :  { %v1547_v43 = vmax.f32 %v1491_v57, 0.0 }
 0x2fb   :  { %v1270_v45 = vpop.f32.mrb[92].mxu1 }
 0x2fc   :  { %v2122_v63 = vpack.c.bf16 %v1547_v43, %v1546_v41  ;;  %v1271_v46 = vadd.f32 %v2670_v1, %v1270_v45  ;;  %v1272_v29 = vpop.f32.mrb[93].mxu1 }
 0x2fd   :  { %v1273_v47 = vpop.f32.mrb[94].mxu1 }
 0x2fe   :  { %2150 = vst [vmem:[#allocation8 + $0xb0] sm:$0xff] %v2122_v63   ;;  %v1496_v34 = vadd.f32 %v2729_v9, %v1271_v46  ;;  %v1274_v50 = vadd.f32 %v2670_v1, %v1273_v47  ;;  %v1275_v51 = vpop.f32.mrb[95].mxu1 }
 0x300   :  { %v1499_v52 = vadd.f32 %v2735_v16, %v1274_v50  ;;  %v1548_v11 = vmax.f32 %v1496_v34, 0.0 }
 0x302   :  { %v1549_v17 = vmax.f32 %v1499_v52, 0.0 }
 0x304   :  { %v2127_v53 = vpack.c.bf16 %v1549_v17, %v1548_v11 }
 0x306   :  { %2151 = vst [vmem:[#allocation8 + $0xb8] sm:$0xff] %v2127_v53  }
 0x307   :  { %2558 = shalt.err (!%p2555_p0)
}
 0x308   :  { %s2559_s8 = scalar_lea.hbm %s2790_s4, 3072 }
 0x309   :  { %p2560_p1 = scmp.ne.s32.totalorder %s2790_s4, %s2559_s8  ;;  %p2563_p2 = scmp.lt.u32.totalorder %s2559_s8, %s2790_s4 }
 0x30b   :  { %p2565_p3 = pnand %p2563_p2, %p2560_p1 }
 0x30d   :  { %2568 = shalt.err (!%p2565_p3)
}
 0x30e   :  { %1801 = dma.vmem_to_hbm [thread:$0]  %s1796_s30, 3072, %s2790_s4, [#allocation4], %s2576_s25, %s2576_s25, %s2577_s26  }
 0x30f   :  { %2573 = dma.done.wait [#allocation4], 3072  }
 0x310   :  { %2574 = vsyncadd [#allocation4], 4294964224 }
 0x311   :  { %1805 = vsyncpa [#allocation3], 1 }
 0x312   :  { %1806 = vsyncpa [#allocation6], 1 }
 0x313   :  { %1807 = vsyncpa [#allocation4], 1 }

</bundles_post_ra>
